<compile_context>
chip_gen: v5e
topology: v5e:2x2
jax: 0.10.0
libtpu: 0.0.40
codegen_flags: <defaults>
</compile_context>

<pallas_src>
import jax
import jax.numpy as jnp
from jax.experimental import pallas as pl
from jax.experimental.pallas import tpu as pltpu

# ---- module hyperparameters (from Widar_ViTLSTM / PatchEmbedding defaults) ----
IN_CHANNELS = 1
PATCH_W = 2          # kernel/stride along the 22 (height) axis
PATCH_H = 40         # kernel/stride along the 400 (width) axis
EMB = PATCH_W * PATCH_H                 # 80
IMG_H, IMG_W = 22, 400
N_PATCH_H = IMG_H // PATCH_W            # 11
N_PATCH_W = IMG_W // PATCH_H            # 10
NUM_PATCHES = N_PATCH_H * N_PATCH_W     # 110
SEQ_LEN = (IMG_H * IMG_W) // EMB + 1    # 111
PATCH_DIM = IN_CHANNELS * PATCH_W * PATCH_H   # 80

DEFAULT_BLOCK_B = 64   # batch elements processed per grid step


def _patch_embed_kernel(x_ref, w_ref, pos_ref, o_ref):
    """One batch tile.

    x_ref:   (BT, SEQ_LEN, PATCH_DIM)  -- row 0 of every element is all-zero
    w_ref:   (PATCH_DIM, EMB)          -- flattened conv weight (transposed)
    pos_ref: (SEQ_LEN, EMB)            -- cls / bias / position folded together
    o_ref:   (BT, SEQ_LEN, EMB)
    """
    bt = x_ref.shape[0]
    # Batched MXU matmul: (BT, 111, 80) x (BT, 80, 80) -> (BT, 111, 80).
    w_b = jnp.broadcast_to(w_ref[...], (bt,) + w_ref.shape)
    proj = jax.lax.dot_general(
        x_ref[...], w_b,
        dimension_numbers=(((2,), (1,)), ((0,), (0,))),
        preferred_element_type=jnp.float32)
    # Single aligned full-tile store; the cls row is 0 @ W + pos_eff[0].
    o_ref[...] = (proj + pos_ref[...]).astype(o_ref.dtype)


def widar_patch_embedding(x, w_conv, b_conv, cls_token, position,
                          *, block_b=DEFAULT_BLOCK_B):
    """x: anything reshapeable to (-1, 1, 22, 400) (NCHW). Returns (B, 111, 80)."""
    x = jnp.reshape(x, (-1, IN_CHANNELS, IMG_H, IMG_W)).astype(jnp.float32)
    B = x.shape[0]

    # --- host prep (single fused pass over x; C == 1 squeezed) ----------------
    # Non-overlapping patches, flattened (kh major, kw minor) to match the
    # Conv2d weight flattening; sequence order (h w) matches the Rearrange.
    xr = x.reshape(B, N_PATCH_H, PATCH_W, N_PATCH_W, PATCH_H)
    patches = xr.transpose(0, 1, 3, 2, 4).reshape(B, NUM_PATCHES, PATCH_DIM)
    # Prepend a zero patch row per element so the cls row comes out of the very
    # same matmul + add + full-tile store path.
    patches = jnp.pad(patches, ((0, 0), (1, 0), (0, 0)))           # (B, 111, 80)

    # Conv weight (EMB, C, kh, kw) -> (PATCH_DIM, EMB) so projection = p @ W.
    w_mat = w_conv.reshape(EMB, PATCH_DIM).T.astype(jnp.float32)

    pos = position.reshape(SEQ_LEN, EMB).astype(jnp.float32)
    pos_eff = jnp.concatenate(
        [cls_token.reshape(1, EMB).astype(jnp.float32) + pos[0:1],
         pos[1:] + b_conv.reshape(1, EMB).astype(jnp.float32)],
        axis=0)                                                    # (111, 80)

    # --- batch tiling ---------------------------------------------------------
    bt = max(1, min(block_b, B))
    num_blocks = -(-B // bt)
    b_pad = num_blocks * bt
    if b_pad != B:
        patches = jnp.pad(patches, ((0, b_pad - B), (0, 0), (0, 0)))

    out = pl.pallas_call(
        _patch_embed_kernel,
        out_shape=jax.ShapeDtypeStruct((b_pad, SEQ_LEN, EMB), jnp.float32),
        grid_spec=pltpu.PrefetchScalarGridSpec(
            num_scalar_prefetch=0,
            grid=(num_blocks,),
            in_specs=[
                pl.BlockSpec((bt, SEQ_LEN, PATCH_DIM), lambda i: (i, 0, 0)),
                pl.BlockSpec((PATCH_DIM, EMB), lambda i: (0, 0)),
                pl.BlockSpec((SEQ_LEN, EMB), lambda i: (0, 0)),
            ],
            out_specs=pl.BlockSpec((bt, SEQ_LEN, EMB), lambda i: (i, 0, 0)),
        ),
        compiler_params=pltpu.CompilerParams(
            dimension_semantics=("parallel",),
            vmem_limit_bytes=48 * 1024 * 1024,
        ),
    )(patches, w_mat, pos_eff)

    return out[:B] if b_pad != B else out


def _reference(x, w_conv, b_conv, cls_token, position):
    """Pure-JAX reference mirroring the PyTorch forward."""
    x = jnp.reshape(x, (-1, IN_CHANNELS, IMG_H, IMG_W)).astype(jnp.float32)
    B = x.shape[0]
    conv = jax.lax.conv_general_dilated(
        x, w_conv,
        window_strides=(PATCH_W, PATCH_H),
        padding="VALID",
        dimension_numbers=("NCHW", "OIHW", "NCHW"),
    ) + b_conv.reshape(1, EMB, 1, 1)                               # (B, 80, 11, 10)
    seq = conv.reshape(B, EMB, NUM_PATCHES).transpose(0, 2, 1)     # (B, 110, 80)
    cls = jnp.broadcast_to(cls_token.reshape(1, 1, EMB), (B, 1, EMB))
    out = jnp.concatenate([cls, seq], axis=1) + position.reshape(1, SEQ_LEN, EMB)
    return out


if __name__ == "__main__":
    key = jax.random.PRNGKey(0)
    k_x, k_w, k_b, k_cls, k_pos = jax.random.split(key, 5)

    B = 2
    x = jax.random.normal(k_x, (B, IN_CHANNELS, IMG_H, IMG_W), dtype=jnp.float32)

    # Deterministic parameter init (shapes per nn.Conv2d / nn.Parameter in __init__).
    w_conv = jax.random.normal(k_w, (EMB, IN_CHANNELS, PATCH_W, PATCH_H),
                               dtype=jnp.float32) * 0.02
    b_conv = jax.random.normal(k_b, (EMB,), dtype=jnp.float32) * 0.02
    cls_token = jax.random.normal(k_cls, (1, 1, EMB), dtype=jnp.float32)
    position = jax.random.normal(k_pos, (SEQ_LEN, EMB), dtype=jnp.float32)

    out = widar_patch_embedding(x, w_conv, b_conv, cls_token, position)
    out = jax.block_until_ready(out)

    ref = _reference(x, w_conv, b_conv, cls_token, position)
    assert out.shape == (B, SEQ_LEN, EMB), out.shape
    max_err = float(jnp.max(jnp.abs(out - ref)))
    assert jnp.allclose(out, ref, atol=1e-3, rtol=1e-3), max_err

    print("KERNEL_OK")
</pallas_src>

<mosaic_0001>
module attributes {stable_mosaic.version = 11 : i64} {
  func.func @_patch_embed_kernel(%arg0: i32, %arg1: memref<2x111x80xf32, #tpu.memory_space<vmem>>, %arg2: memref<80x80xf32, #tpu.memory_space<vmem>>, %arg3: memref<111x80xf32, #tpu.memory_space<vmem>>, %arg4: memref<2x111x80xf32, #tpu.memory_space<vmem>>) attributes {dimension_semantics = [#tpu.dimension_semantics<parallel>], iteration_bounds = array<i64: 1>, scalar_prefetch = 0 : i64, scratch_operands = 0 : i64, tpu.core_type = #tpu.core_type<tc>, window_params = [{transform_indices = @transform_0, window_bounds = array<i64: 2, 111, 80>}, {pipeline_mode = #tpu.pipeline_mode<synchronous>, transform_indices = @transform_1, window_bounds = array<i64: 80, 80>}, {pipeline_mode = #tpu.pipeline_mode<synchronous>, transform_indices = @transform_2, window_bounds = array<i64: 111, 80>}, {transform_indices = @transform_3, window_bounds = array<i64: 2, 111, 80>}]} {
    %c0 = arith.constant 0 : index
    %c0_0 = arith.constant 0 : index
    %0 = vector.load %arg2[%c0, %c0_0] : memref<80x80xf32, #tpu.memory_space<vmem>>, vector<80x80xf32>
    %1 = vector.shape_cast %0 : vector<80x80xf32> to vector<1x80x80xf32>
    %2 = vector.broadcast %1 : vector<1x80x80xf32> to vector<2x80x80xf32>
    %c0_1 = arith.constant 0 : index
    %c0_2 = arith.constant 0 : index
    %c0_3 = arith.constant 0 : index
    %3 = vector.load %arg1[%c0_1, %c0_2, %c0_3] : memref<2x111x80xf32, #tpu.memory_space<vmem>>, vector<2x111x80xf32>
    %cst = arith.constant dense<0.000000e+00> : vector<2x111x80xf32>
    %4 = tpu.matmul %3, %2, %cst {dimension_numbers = #tpu.dot_dimension_numbers<[2], [1], [1], [2], [0, 0, 0, 1, 1, 2], [0], [0]>} : vector<2x111x80xf32>, vector<2x80x80xf32>, vector<2x111x80xf32> -> vector<2x111x80xf32>
    %c0_4 = arith.constant 0 : index
    %c0_5 = arith.constant 0 : index
    %5 = vector.load %arg3[%c0_4, %c0_5] : memref<111x80xf32, #tpu.memory_space<vmem>>, vector<111x80xf32>
    %6 = vector.shape_cast %5 : vector<111x80xf32> to vector<1x111x80xf32>
    %7 = vector.broadcast %6 : vector<1x111x80xf32> to vector<2x111x80xf32>
    %8 = arith.addf %4, %7 : vector<2x111x80xf32>
    %c0_6 = arith.constant 0 : index
    %c0_7 = arith.constant 0 : index
    %c0_8 = arith.constant 0 : index
    %9 = vector.load %arg4[%c0_6, %c0_7, %c0_8] : memref<2x111x80xf32, #tpu.memory_space<vmem>>, vector<2x111x80xf32>
    tpu.vector_store %arg4[%c0_6, %c0_7, %c0_8], %8 {strides = array<i32>} : memref<2x111x80xf32, #tpu.memory_space<vmem>>, vector<2x111x80xf32>,
    return
  }
  func.func @transform_0(%arg0: i32) -> (i32, i32, i32) {
    %c0_i32 = arith.constant 0 : i32
    %c0_i32_0 = arith.constant 0 : i32
    %c0_i32_1 = arith.constant 0 : i32
    return %arg0, %c0_i32, %c0_i32_0 : i32, i32, i32
  }
  func.func @transform_1(%arg0: i32) -> (i32, i32) {
    %c0_i32 = arith.constant 0 : i32
    %c0_i32_0 = arith.constant 0 : i32
    %c0_i32_1 = arith.constant 0 : i32
    return %c0_i32, %c0_i32_0 : i32, i32
  }
  func.func @transform_2(%arg0: i32) -> (i32, i32) {
    %c0_i32 = arith.constant 0 : i32
    %c0_i32_0 = arith.constant 0 : i32
    %c0_i32_1 = arith.constant 0 : i32
    return %c0_i32, %c0_i32_0 : i32, i32
  }
  func.func @transform_3(%arg0: i32) -> (i32, i32, i32) {
    %c0_i32 = arith.constant 0 : i32
    %c0_i32_0 = arith.constant 0 : i32
    %c0_i32_1 = arith.constant 0 : i32
    return %arg0, %c0_i32, %c0_i32_0 : i32, i32, i32
  }
}

</mosaic_0001>

<bundles_post_ra>
// kernel: tpu_custom_call.1
= control target key start
LH: loop header
LB: loop body
LE: loop exit
PB: predicated region body
PF: predicated region fallthrough
CT: control target
= control target key end

     0   :  { %vm66_vm0 = vcmask 654336   ;;  %vm282_vm1 = vcmask 653312   ;;  %s664_s1 = inlined_call_operand.vmem [shape: f32[80,80], index: 1, kind: input, shape index: {}]   ;;  %s665_s0 = inlined_call_operand.vmem [shape: f32[2,111,80], index: 0, kind: input, shape index: {}]   ;;  %s666_s2 = inlined_call_operand.vmem [shape: f32[111,80], index: 2, kind: input, shape index: {}]   ;;  %s667_s3 = inlined_call_operand.vmem [shape: f32[2,111,80], index: 3, kind: output, shape index: {}]  }
   0x1   :  { %v23_v0 = vld [vmem:[%s664_s1 + $0x48] sm:$0xff]  ;;  %v22_v1 = vld [vmem:[%s664_s1 + $0x40] sm:$0xff]  ;;  %v21_v2 = vld [vmem:[%s664_s1 + $0x38] sm:$0xff] }
   0x2   :  { %330 = vmatpush.msra.mxu2 %v23_v0  ;;  %340 = vmatpush.msra.mxu3 %v23_v0  ;;  %v20_v3 = vld [vmem:[%s664_s1 + $0x30] sm:$0xff]  ;;  %v19_v4 = vld [vmem:[%s664_s1 + $0x28] sm:$0xff]  ;;  %v18_v5 = vld [vmem:[%s664_s1 + $0x20] sm:$0xff] }
   0x3   :  { %115 = vmatpush.msra.mxu0 %v23_v0  ;;  %216 = vmatpush.msra.mxu1 %v23_v0  ;;  %v17_v6 = vld [vmem:[%s664_s1 + $0x18] sm:$0xff]  ;;  %v16_v7 = vld [vmem:[%s664_s1 + $0x10] sm:$0xff]  ;;  %v15_v8 = vld [vmem:[%s664_s1 + $0x8] sm:$0xff] }
   0x4   :  { %331 = vmatpush.msra.mxu2 %v22_v1  ;;  %341 = vmatpush.msra.mxu3 %v22_v1  ;;  %v14_v9 = vld [vmem:[%s664_s1] sm:$0xff]  ;;  %v31_v10 = vld [vmem:[%s665_s0 + $0x38] sm:$0xff]  ;;  %v45_v11 = vld [vmem:[%s665_s0 + $0xa8] sm:$0xff] }
   0x5   :  { %116 = vmatpush.msra.mxu0 %v22_v1  ;;  %217 = vmatpush.msra.mxu1 %v22_v1  ;;  %v24_v12 = vld [vmem:[%s665_s0] sm:$0xff]  ;;  %v38_v13 = vld [vmem:[%s665_s0 + $0x70] sm:$0xff]  ;;  %v25_v16 = vld [vmem:[%s665_s0 + $0x8] sm:$0xff] }
   0x6   :  { %332 = vmatpush.msra.mxu2 %v21_v2  ;;  %342 = vmatpush.msra.mxu3 %v21_v2  ;;  %v32_v14 = vld [vmem:[%s665_s0 + $0x40] sm:$0xff]  ;;  %v46_v15 = vld [vmem:[%s665_s0 + $0xb0] sm:$0xff]  ;;  %v39_v17 = vld [vmem:[%s665_s0 + $0x78] sm:$0xff] }
   0x7   :  { %117 = vmatpush.msra.mxu0 %v21_v2  ;;  %218 = vmatpush.msra.mxu1 %v21_v2  ;;  %v33_v18 = vld [vmem:[%s665_s0 + $0x48] sm:$0xff]  ;;  %v47_v19 = vld [vmem:[%s665_s0 + $0xb8] sm:$0xff]  ;;  %v26_v20 = vld [vmem:[%s665_s0 + $0x10] sm:$0xff] }
   0x8   :  { %333 = vmatpush.msra.mxu2 %v20_v3  ;;  %343 = vmatpush.msra.mxu3 %v20_v3  ;;  %v40_v21 = vld [vmem:[%s665_s0 + $0x80] sm:$0xff]  ;;  %v34_v22 = vld [vmem:[%s665_s0 + $0x50] sm:$0xff]  ;;  %v27_v24 = vld [vmem:[%s665_s0 + $0x18] sm:$0xff] }
   0x9   :  { %118 = vmatpush.msra.mxu0 %v20_v3  ;;  %219 = vmatpush.msra.mxu1 %v20_v3  ;;  %v48_v23 = vld [vmem:[%s665_s0 + $0xc0] sm:$0xff]  ;;  %v41_v25 = vld [vmem:[%s665_s0 + $0x88] sm:$0xff]  ;;  %v35_v26 = vld [vmem:[%s665_s0 + $0x58] sm:$0xff] }
   0xa   :  { %334 = vmatpush.msra.mxu2 %v19_v4  ;;  %344 = vmatpush.msra.mxu3 %v19_v4  ;;  %v49_v27 = vld [vmem:[%s665_s0 + $0xc8] sm:$0xff]  ;;  %v28_v28 = vld [vmem:[%s665_s0 + $0x20] sm:$0xff]  ;;  %v42_v29 = vld [vmem:[%s665_s0 + $0x90] sm:$0xff] }
   0xb   :  { %119 = vmatpush.msra.mxu0 %v19_v4  ;;  %220 = vmatpush.msra.mxu1 %v19_v4  ;;  %v36_v30 = vld [vmem:[%s665_s0 + $0x60] sm:$0xff]  ;;  %v50_v31 = vld [vmem:[%s665_s0 + $0xd0] sm:$0xff]  ;;  %v29_v32 = vld [vmem:[%s665_s0 + $0x28] sm:$0xff] }
   0xc   :  { %335 = vmatpush.msra.mxu2 %v18_v5  ;;  %345 = vmatpush.msra.mxu3 %v18_v5  ;;  %v43_v33 = vld [vmem:[%s665_s0 + $0x98] sm:$0xff]  ;;  %v37_v34 = vld [vmem:[%s665_s0 + $0x68] sm:$0x7f]  ;;  %v30_v36 = vld [vmem:[%s665_s0 + $0x30] sm:$0xff] }
   0xd   :  { %120 = vmatpush.msra.mxu0 %v18_v5  ;;  %221 = vmatpush.msra.mxu1 %v18_v5  ;;  %v51_v35 = vld [vmem:[%s665_s0 + $0xd8] sm:$0x7f]  ;;  %v44_v37 = vld [vmem:[%s665_s0 + $0xa0] sm:$0xff]  ;;  %v53_v48 = vld [vmem:[%s666_s2 + $0x8] sm:$0xff] }
   0xe   :  { %336 = vmatpush.msra.mxu2 %v17_v6  ;;  %346 = vmatpush.msra.mxu3 %v17_v6  ;;  %v52_v38 = vld [vmem:[%s666_s2] sm:$0xff]  ;;  %v59_v43 = vld [vmem:[%s666_s2 + $0x38] sm:$0xff]  ;;  %v54_v58 = vld [vmem:[%s666_s2 + $0x10] sm:$0xff] }
   0xf   :  { %121 = vmatpush.msra.mxu0 %v17_v6  ;;  %222 = vmatpush.msra.mxu1 %v17_v6  ;;  %v60_v53 = vld [vmem:[%s666_s2 + $0x40] sm:$0xff]  ;;  %v61_v63 = vld [vmem:[%s666_s2 + $0x48] sm:$0xff]  ;;  %v55_v4 = vld [vmem:[%s666_s2 + $0x18] sm:$0xff] }
  0x10   :  { %337 = vmatpush.msra.mxu2 %v16_v7  ;;  %347 = vmatpush.msra.mxu3 %v16_v7 }
  0x11   :  { %122 = vmatpush.msra.mxu0 %v16_v7  ;;  %223 = vmatpush.msra.mxu1 %v16_v7 }
  0x12   :  { %338 = vmatpush.msra.mxu2 %v15_v8  ;;  %348 = vmatpush.msra.mxu3 %v15_v8 }
  0x13   :  { %123 = vmatpush.msra.mxu0 %v15_v8  ;;  %224 = vmatpush.msra.mxu1 %v15_v8 }
  0x14   :  { %339 = vmatpush.msra.mxu2 %v14_v9  ;;  %349 = vmatpush.msra.mxu3 %v14_v9 }
  0x15   :  { %309 = vmatmul.msk.f32.vlgmr.msra.gmra.mxu2 %vm66_vm0, %v31_v10  ;;  %323 = vmatmul.msk.f32.vlgmr.msra.gmra.mxu3 %vm66_vm0, %v45_v11 }
  0x16   :  { %124 = vmatpush.msra.mxu0 %v14_v9  ;;  %225 = vmatpush.msra.mxu1 %v14_v9  ;;  %v62_v9 = vld [vmem:[%s666_s2 + $0x50] sm:$0xff] }
  0x17   :  { %302 = vmatmul.msk.f32.vlgmr.msra.gmra.mxu0 %vm66_vm0, %v24_v12  ;;  %316 = vmatmul.msk.f32.vlgmr.msra.gmra.mxu1 %vm66_vm0, %v38_v13 }
  0x1d   :  { %310 = vmatmul.msk.f32.gmra.mxu2 %vm66_vm0, %v32_v14  ;;  %324 = vmatmul.msk.f32.gmra.mxu3 %vm66_vm0, %v46_v15  ;;  %v56_v14 = vld [vmem:[%s666_s2 + $0x20] sm:$0xff] }
  0x1f   :  { %303 = vmatmul.msk.f32.gmra.mxu0 %vm66_vm0, %v25_v16  ;;  %317 = vmatmul.msk.f32.gmra.mxu1 %vm66_vm0, %v39_v17 }
  0x25   :  { %311 = vmatmul.msk.f32.gmra.mxu2 %vm66_vm0, %v33_v18  ;;  %325 = vmatmul.msk.f32.gmra.mxu3 %vm66_vm0, %v47_v19  ;;  %v63_v19 = vld [vmem:[%s666_s2 + $0x58] sm:$0xff] }
  0x27   :  { %304 = vmatmul.msk.f32.gmra.mxu0 %vm66_vm0, %v26_v20  ;;  %318 = vmatmul.msk.f32.gmra.mxu1 %vm66_vm0, %v40_v21 }
  0x2d   :  { %312 = vmatmul.msk.f32.gmra.mxu2 %vm66_vm0, %v34_v22  ;;  %326 = vmatmul.msk.f32.gmra.mxu3 %vm66_vm0, %v48_v23 }
  0x2f   :  { %305 = vmatmul.msk.f32.gmra.mxu0 %vm66_vm0, %v27_v24  ;;  %319 = vmatmul.msk.f32.gmra.mxu1 %vm66_vm0, %v41_v25  ;;  %v57_v24 = vld [vmem:[%s666_s2 + $0x28] sm:$0xff] }
  0x35   :  { %313 = vmatmul.msk.f32.gmra.mxu2 %vm66_vm0, %v35_v26  ;;  %327 = vmatmul.msk.f32.gmra.mxu3 %vm66_vm0, %v49_v27 }
  0x37   :  { %306 = vmatmul.msk.f32.gmra.mxu0 %vm66_vm0, %v28_v28  ;;  %320 = vmatmul.msk.f32.gmra.mxu1 %vm66_vm0, %v42_v29  ;;  %v64_v29 = vld [vmem:[%s666_s2 + $0x60] sm:$0xff] }
  0x3d   :  { %314 = vmatmul.msk.f32.gmra.mxu2 %vm66_vm0, %v36_v30  ;;  %328 = vmatmul.msk.f32.gmra.mxu3 %vm66_vm0, %v50_v31 }
  0x3f   :  { %307 = vmatmul.msk.f32.gmra.mxu0 %vm66_vm0, %v29_v32  ;;  %321 = vmatmul.msk.f32.gmra.mxu1 %vm66_vm0, %v43_v33 }
  0x45   :  { %315 = vmatmul.msk.f32.gmra.mxu2 %vm66_vm0, %v37_v34  ;;  %329 = vmatmul.msk.f32.gmra.mxu3 %vm66_vm0, %v51_v35  ;;  %v58_v34 = vld [vmem:[%s666_s2 + $0x30] sm:$0xff] }
  0x47   :  { %308 = vmatmul.msk.f32.gmra.mxu0 %vm66_vm0, %v30_v36  ;;  %322 = vmatmul.msk.f32.gmra.mxu1 %vm66_vm0, %v44_v37 }
  0x94   :  { %v126_v39 = vpop.f32.mrf.mxu0  ;;  %v227_v40 = vpop.f32.mrf.mxu1 }
  0x95   :  { %v127_v41 = vadd.f32 %v126_v39, %v52_v38  ;;  %v228_v42 = vadd.f32 %v227_v40, %v52_v38  ;;  %v65_v39 = vld [vmem:[%s666_s2 + $0x68] sm:$0x7f] }
  0x97   :  { %269 = vst.msk [vmem:[%s667_s3] sm:$0xff] %vm66_vm0, %v127_v41 }
  0x98   :  { %v147_v44 = vpop.f32.mrf.mxu2  ;;  %284 = vst.msk [vmem:[%s667_s3 + $0x70] sm:$0xff] %vm66_vm0, %v228_v42  ;;  %v248_v45 = vpop.f32.mrf.mxu3 }
  0x99   :  { %v148_v46 = vadd.f32 %v147_v44, %v59_v43  ;;  %v249_v47 = vadd.f32 %v248_v45, %v59_v43 }
  0x9b   :  { %276 = vst.msk [vmem:[%s667_s3 + $0x38] sm:$0xff] %vm66_vm0, %v148_v46 }
  0x9c   :  { %291 = vst.msk [vmem:[%s667_s3 + $0xa8] sm:$0xff] %vm66_vm0, %v249_v47  ;;  %v129_v49 = vpop.f32.mrf.mxu0  ;;  %v230_v50 = vpop.f32.mrf.mxu1 }
  0x9d   :  { %v130_v51 = vadd.f32 %v129_v49, %v53_v48  ;;  %v231_v52 = vadd.f32 %v230_v50, %v53_v48 }
  0x9f   :  { %270 = vst.msk [vmem:[%s667_s3 + $0x8] sm:$0xff] %vm66_vm0, %v130_v51 }
  0xa0   :  { %v150_v54 = vpop.f32.mrf.mxu2  ;;  %285 = vst.msk [vmem:[%s667_s3 + $0x78] sm:$0xff] %vm66_vm0, %v231_v52  ;;  %v251_v55 = vpop.f32.mrf.mxu3 }
  0xa1   :  { %v151_v56 = vadd.f32 %v150_v54, %v60_v53  ;;  %v252_v57 = vadd.f32 %v251_v55, %v60_v53 }
  0xa3   :  { %277 = vst.msk [vmem:[%s667_s3 + $0x40] sm:$0xff] %vm66_vm0, %v151_v56 }
  0xa4   :  { %292 = vst.msk [vmem:[%s667_s3 + $0xb0] sm:$0xff] %vm66_vm0, %v252_v57  ;;  %v132_v59 = vpop.f32.mrf.mxu0  ;;  %v233_v60 = vpop.f32.mrf.mxu1 }
  0xa5   :  { %v133_v61 = vadd.f32 %v132_v59, %v54_v58  ;;  %v234_v62 = vadd.f32 %v233_v60, %v54_v58 }
  0xa7   :  { %271 = vst.msk [vmem:[%s667_s3 + $0x10] sm:$0xff] %vm66_vm0, %v133_v61 }
  0xa8   :  { %v153_v0 = vpop.f32.mrf.mxu2  ;;  %286 = vst.msk [vmem:[%s667_s3 + $0x80] sm:$0xff] %vm66_vm0, %v234_v62  ;;  %v254_v1 = vpop.f32.mrf.mxu3 }
  0xa9   :  { %v154_v2 = vadd.f32 %v153_v0, %v61_v63  ;;  %v255_v3 = vadd.f32 %v254_v1, %v61_v63 }
  0xab   :  { %278 = vst.msk [vmem:[%s667_s3 + $0x48] sm:$0xff] %vm66_vm0, %v154_v2 }
  0xac   :  { %293 = vst.msk [vmem:[%s667_s3 + $0xb8] sm:$0xff] %vm66_vm0, %v255_v3  ;;  %v135_v5 = vpop.f32.mrf.mxu0  ;;  %v236_v6 = vpop.f32.mrf.mxu1 }
  0xad   :  { %v136_v7 = vadd.f32 %v135_v5, %v55_v4  ;;  %v237_v8 = vadd.f32 %v236_v6, %v55_v4 }
  0xaf   :  { %272 = vst.msk [vmem:[%s667_s3 + $0x18] sm:$0xff] %vm66_vm0, %v136_v7 }
  0xb0   :  { %v156_v10 = vpop.f32.mrf.mxu2  ;;  %287 = vst.msk [vmem:[%s667_s3 + $0x88] sm:$0xff] %vm66_vm0, %v237_v8  ;;  %v257_v11 = vpop.f32.mrf.mxu3 }
  0xb1   :  { %v157_v12 = vadd.f32 %v156_v10, %v62_v9  ;;  %v258_v13 = vadd.f32 %v257_v11, %v62_v9 }
  0xb3   :  { %279 = vst.msk [vmem:[%s667_s3 + $0x50] sm:$0xff] %vm66_vm0, %v157_v12 }
  0xb4   :  { %294 = vst.msk [vmem:[%s667_s3 + $0xc0] sm:$0xff] %vm66_vm0, %v258_v13  ;;  %v138_v15 = vpop.f32.mrf.mxu0  ;;  %v239_v16 = vpop.f32.mrf.mxu1 }
  0xb5   :  { %v139_v17 = vadd.f32 %v138_v15, %v56_v14  ;;  %v240_v18 = vadd.f32 %v239_v16, %v56_v14 }
  0xb7   :  { %273 = vst.msk [vmem:[%s667_s3 + $0x20] sm:$0xff] %vm66_vm0, %v139_v17 }
  0xb8   :  { %v159_v20 = vpop.f32.mrf.mxu2  ;;  %288 = vst.msk [vmem:[%s667_s3 + $0x90] sm:$0xff] %vm66_vm0, %v240_v18  ;;  %v260_v21 = vpop.f32.mrf.mxu3 }
  0xb9   :  { %v160_v22 = vadd.f32 %v159_v20, %v63_v19  ;;  %v261_v23 = vadd.f32 %v260_v21, %v63_v19 }
  0xbb   :  { %280 = vst.msk [vmem:[%s667_s3 + $0x58] sm:$0xff] %vm66_vm0, %v160_v22 }
  0xbc   :  { %295 = vst.msk [vmem:[%s667_s3 + $0xc8] sm:$0xff] %vm66_vm0, %v261_v23  ;;  %v141_v25 = vpop.f32.mrf.mxu0  ;;  %v242_v26 = vpop.f32.mrf.mxu1 }
  0xbd   :  { %v142_v27 = vadd.f32 %v141_v25, %v57_v24  ;;  %v243_v28 = vadd.f32 %v242_v26, %v57_v24 }
  0xbf   :  { %274 = vst.msk [vmem:[%s667_s3 + $0x28] sm:$0xff] %vm66_vm0, %v142_v27 }
  0xc0   :  { %v162_v30 = vpop.f32.mrf.mxu2  ;;  %289 = vst.msk [vmem:[%s667_s3 + $0x98] sm:$0xff] %vm66_vm0, %v243_v28  ;;  %v263_v31 = vpop.f32.mrf.mxu3 }
  0xc1   :  { %v163_v32 = vadd.f32 %v162_v30, %v64_v29  ;;  %v264_v33 = vadd.f32 %v263_v31, %v64_v29 }
  0xc3   :  { %281 = vst.msk [vmem:[%s667_s3 + $0x60] sm:$0xff] %vm66_vm0, %v163_v32 }
  0xc4   :  { %296 = vst.msk [vmem:[%s667_s3 + $0xd0] sm:$0xff] %vm66_vm0, %v264_v33  ;;  %v144_v35 = vpop.f32.mrf.mxu0  ;;  %v245_v36 = vpop.f32.mrf.mxu1 }
  0xc5   :  { %v145_v37 = vadd.f32 %v144_v35, %v58_v34  ;;  %v246_v38 = vadd.f32 %v245_v36, %v58_v34 }
  0xc7   :  { %275 = vst.msk [vmem:[%s667_s3 + $0x30] sm:$0xff] %vm66_vm0, %v145_v37 }
  0xc8   :  { %v165_v40 = vpop.f32.mrf.mxu2  ;;  %290 = vst.msk [vmem:[%s667_s3 + $0xa0] sm:$0xff] %vm66_vm0, %v246_v38  ;;  %v266_v41 = vpop.f32.mrf.mxu3 }
  0xc9   :  { %v166_v42 = vadd.f32 %v165_v40, %v65_v39  ;;  %v267_v43 = vadd.f32 %v266_v41, %v65_v39 }
  0xcb   :  { %283 = vst.msk [vmem:[%s667_s3 + $0x68] sm:$0x7f] %vm282_vm1, %v166_v42 }
  0xcc   :  { %297 = vst.msk [vmem:[%s667_s3 + $0xd8] sm:$0x7f] %vm282_vm1, %v267_v43 }

</bundles_post_ra>
